<compile_context>
chip_gen: v6e
topology: v6e:2x2x1
jax: 0.10.0
libtpu: 0.0.40
codegen_flags: <defaults>
</compile_context>

<pallas_src>
import jax
import jax.numpy as jnp
from jax.experimental import pallas as pl
from jax.experimental.pallas import tpu as pltpu

LN_EPS = 1e-12
MXU_COLS = 128          # pad the 2-wide projection to one full MXU tile of columns


def _mrc_kernel(x_ref, w_ref, scal_ref, out_ref):
    """x_ref:    (tile_b, T, H) bf16 -- streamed word+type+pos embedding sum
       w_ref:    (H, 128)       f32  -- cols 0/1 = gamma*w_start / gamma*w_end, col 2 = ones
       scal_ref: (4,)  SMEM     f32  -- [b'_start, b'_end, sum(w'_start), sum(w'_end)]
       out_ref:  (tile_b*T, 2)  f32  -- [:, 0] start logits, [:, 1] end logits
    """
    h = x_ref.shape[-1]
    inv_h = 1.0 / h

    # bf16 stream -> f32 for the LayerNorm math; collapse to (N, H) for the MXU.
    x = x_ref[...].astype(jnp.float32).reshape(-1, h)             # (N, H)

    # All H-reductions on the MXU: one matmul gives the two folded projections plus
    # sum(x) (ones column); a second on x*x gives sum(x^2).  MXU cost is negligible.
    w = w_ref[...]
    r = jnp.dot(x, w, preferred_element_type=jnp.float32)         # (N, 128)
    r2 = jnp.dot(x * x, w, preferred_element_type=jnp.float32)    # (N, 128)

    s0 = r[:, 0:1]                                                # sum(x * w'_0)
    s1 = r[:, 1:2]                                                # sum(x * w'_1)
    mean = r[:, 2:3] * inv_h
    var = r2[:, 2:3] * inv_h - mean * mean
    inv = jax.lax.rsqrt(var + LN_EPS)                             # (N, 1)

    # logit_k = inv * (s_k - mean * sum(w'_k)) + b'_k   (gamma/beta already folded)
    out_ref[:, 0:1] = inv * (s0 - mean * scal_ref[2]) + scal_ref[0]
    out_ref[:, 1:2] = inv * (s1 - mean * scal_ref[3]) + scal_ref[1]


def _vmem_capacity_bytes():
    try:
        return int(pltpu.get_tpu_info().vmem_capacity_bytes)
    except Exception:
        return 64 * 1024 * 1024       # conservative: v7x per-TC VMEM


def bert_query_mrc_forward(word_ids, token_type, params, *, max_tile_rows=None):
    """word_ids, token_type: (B, T) int.  Returns (start_logits, end_logits), each (B, T) f32."""
    B, T = word_ids.shape
    word_table = params["word_table"]                  # (V, H) bf16
    H = word_table.shape[1]

    # --- generation-aware VMEM budget (review items 4/5/6/7) ------------------------
    vmem_cap = _vmem_capacity_bytes()
    vmem_limit = min(vmem_cap * 3 // 4, 96 * 1024 * 1024)     # 48 MiB on v7x, 96 MiB v5e/v6e
    if max_tile_rows is None:
        max_tile_rows = 8192 if vmem_cap >= 96 * 1024 * 1024 else 4096
    # Per token-row cost: double-buffered bf16 slab (4H) + ~3 live f32 full-tile
    # temporaries (12H) + the two (N,128) f32 matmul results + lane-padded out buffers.
    bytes_per_row = 4 * H + 12 * H + 2 * 4 * MXU_COLS + 2 * 4 * MXU_COLS
    usable = max(vmem_limit - (8 << 20), 1 << 20)              # headroom for W, misc scratch
    row_budget = max(8, usable // bytes_per_row)

    T_pad = -(-T // 8) * 8             # keeps the (tile_b, T, H) -> (N, H) collapse layout-trivial
    tile_b = max(1, min(B,
                        max(1, max_tile_rows // T_pad),
                        max(1, row_budget // T_pad)))
    if B >= 2:
        tile_b = min(tile_b, -(-B // 2))   # >= 2 grid steps so both v7x TCs get work
    num_tiles = -(-B // tile_b)
    B_pad = num_tiles * tile_b

    # --- wrapper-side prep: pad ids, fuse the three embedding adds into the gather,
    #     stream ONE bf16 slab (deliberate bf16 activation quantization). -------------
    word_ids = word_ids.astype(jnp.int32)
    token_type = token_type.astype(jnp.int32)
    pad = ((0, B_pad - B), (0, T_pad - T))
    if pad != ((0, 0), (0, 0)):
        word_ids = jnp.pad(word_ids, pad)
        token_type = jnp.pad(token_type, pad)
    pos = params["pos_table"][:T].astype(jnp.float32)
    pos = jnp.pad(pos, ((0, T_pad - T), (0, 0)))
    emb = (word_table[word_ids].astype(jnp.float32)
           + params["type_table"][token_type]
           + pos[None, :, :]).astype(jnp.bfloat16)     # (B_pad, T_pad, H)

    # Fold LayerNorm gamma/beta into the projection; build the MXU weight tile.
    gamma = params["ln_gamma"].astype(jnp.float32)
    beta = params["ln_beta"].astype(jnp.float32)
    w = params["out_w"].astype(jnp.float32)            # (H, 2)
    b = params["out_b"].astype(jnp.float32)            # (2,)
    wp = w * gamma[:, None]                            # (H, 2)   w'_k = gamma * w_k
    bp = b + beta @ w                                  # (2,)     b'_k = b_k + beta . w_k
    w_pad = jnp.zeros((H, MXU_COLS), jnp.float32)
    w_pad = w_pad.at[:, 0:2].set(wp).at[:, 2].set(1.0)
    scal = jnp.concatenate([bp, jnp.sum(wp, axis=0)])  # (4,)  SMEM scalars

    n_rows = tile_b * T_pad
    out = pl.pallas_call(
        _mrc_kernel,
        out_shape=jax.ShapeDtypeStruct((B_pad * T_pad, 2), jnp.float32),
        grid_spec=pltpu.PrefetchScalarGridSpec(
            num_scalar_prefetch=0,
            grid=(num_tiles,),
            in_specs=[
                pl.BlockSpec((tile_b, T_pad, H), lambda i: (i, 0, 0)),   # streamed bf16 slab
                pl.BlockSpec((H, MXU_COLS), lambda i: (0, 0)),           # resident folded weights
                pl.BlockSpec(memory_space=pltpu.MemorySpace.SMEM),       # folded bias / col sums
            ],
            out_specs=pl.BlockSpec((n_rows, 2), lambda i: (i, 0)),
        ),
        compiler_params=pltpu.CompilerParams(
            dimension_semantics=("parallel",),
            vmem_limit_bytes=vmem_limit,
        ),
    )(emb, w_pad, scal)

    out = out.reshape(B_pad, T_pad, 2)[:B, :T]         # (B, T, 2)
    return out[..., 0], out[..., 1]


def make_params(key, vocab=100, n_types=2, max_len=64, hidden=32):
    ks = jax.random.split(key, 4)
    scale = 0.02
    return {
        # Word table stored bf16: halves the HBM bytes of the dominant gather read.
        "word_table": (scale * jax.random.normal(ks[0], (vocab, hidden), jnp.float32)
                       ).astype(jnp.bfloat16),
        "type_table": scale * jax.random.normal(ks[1], (n_types, hidden), jnp.float32),
        "pos_table": scale * jax.random.normal(ks[2], (max_len, hidden), jnp.float32),
        "ln_gamma": jnp.ones((hidden,), jnp.float32),
        "ln_beta": jnp.zeros((hidden,), jnp.float32),
        "out_w": scale * jax.random.normal(ks[3], (hidden, 2), jnp.float32),
        "out_b": jnp.zeros((2,), jnp.float32),
    }


def _reference_forward(word_ids, token_type, params):
    """Pure-JAX reference.  Mirrors the kernel's deliberate bf16 quantization of the
    streamed embedding sum (the one approximation vs. the all-f32 PyTorch module);
    everything downstream is f32 with HIGHEST-precision matmul."""
    T = word_ids.shape[1]
    emb = (params["word_table"][word_ids].astype(jnp.float32)
           + params["type_table"][token_type]
           + params["pos_table"][:T][None, :, :])
    x = emb.astype(jnp.bfloat16).astype(jnp.float32)
    mean = x.mean(-1, keepdims=True)
    var = ((x - mean) ** 2).mean(-1, keepdims=True)
    xn = (x - mean) / jnp.sqrt(var + LN_EPS)
    xn = xn * params["ln_gamma"] + params["ln_beta"]
    logits = jnp.einsum("bth,hk->btk", xn, params["out_w"],
                        precision=jax.lax.Precision.HIGHEST) + params["out_b"]
    return logits[..., 0], logits[..., 1]


if __name__ == "__main__":
    B, T, H = 2, 8, 32
    key = jax.random.PRNGKey(0)
    kp, kw, kt = jax.random.split(key, 3)

    params = make_params(kp, vocab=100, n_types=2, max_len=64, hidden=H)
    word_ids = jax.random.randint(kw, (B, T), 0, 100, dtype=jnp.int32)
    token_type = jax.random.randint(kt, (B, T), 0, 2, dtype=jnp.int32)

    start_logits, end_logits = bert_query_mrc_forward(word_ids, token_type, params)
    jax.block_until_ready((start_logits, end_logits))

    ref_start, ref_end = _reference_forward(word_ids, token_type, params)
    assert start_logits.shape == (B, T) and end_logits.shape == (B, T)
    # Tolerance covers the variance-formula reassociation and MXU f32 pass-count
    # differences vs. the HIGHEST-precision reference; real algebra bugs are O(0.1).
    assert jnp.allclose(start_logits, ref_start, atol=2e-3, rtol=2e-3), (
        float(jnp.max(jnp.abs(start_logits - ref_start))))
    assert jnp.allclose(end_logits, ref_end, atol=2e-3, rtol=2e-3), (
        float(jnp.max(jnp.abs(end_logits - ref_end))))

    print("KERNEL_OK")
</pallas_src>

<mosaic_0001>
module attributes {stable_mosaic.version = 11 : i64} {
  func.func @_mrc_kernel(%arg0: i32, %arg1: memref<1x8x32xbf16, #tpu.memory_space<vmem>>, %arg2: memref<32x128xf32, #tpu.memory_space<vmem>>, %arg3: memref<4xf32, #tpu.memory_space<smem>>, %arg4: memref<8x2xf32, #tpu.memory_space<vmem>>) attributes {dimension_semantics = [#tpu.dimension_semantics<parallel>], iteration_bounds = array<i64: 2>, scalar_prefetch = 0 : i64, scratch_operands = 0 : i64, tpu.core_type = #tpu.core_type<tc>, window_params = [{transform_indices = @transform_0, window_bounds = array<i64: 1, 8, 32>}, {pipeline_mode = #tpu.pipeline_mode<synchronous>, transform_indices = @transform_1, window_bounds = array<i64: 32, 128>}, {transform_indices = @transform_2, window_bounds = array<i64: 4>}, {transform_indices = @transform_3, window_bounds = array<i64: 8, 2>}]} {
    %c0 = arith.constant 0 : index
    %c0_0 = arith.constant 0 : index
    %c0_1 = arith.constant 0 : index
    %0 = vector.load %arg1[%c0, %c0_0, %c0_1] : memref<1x8x32xbf16, #tpu.memory_space<vmem>>, vector<1x8x32xbf16>
    %1 = arith.extf %0 : vector<1x8x32xbf16> to vector<1x8x32xf32>
    %2 = vector.shape_cast %1 : vector<1x8x32xf32> to vector<8x32xf32>
    %c0_2 = arith.constant 0 : index
    %c0_3 = arith.constant 0 : index
    %3 = vector.load %arg2[%c0_2, %c0_3] : memref<32x128xf32, #tpu.memory_space<vmem>>, vector<32x128xf32>
    %cst = arith.constant dense<0.000000e+00> : vector<8x128xf32>
    %4 = tpu.matmul %2, %3, %cst {dimension_numbers = #tpu.dot_dimension_numbers<[1], [0], [0], [1], [0, 0, 1, 1], [], []>} : vector<8x32xf32>, vector<32x128xf32>, vector<8x128xf32> -> vector<8x128xf32>
    %5 = arith.mulf %2, %2 : vector<8x32xf32>
    %cst_4 = arith.constant dense<0.000000e+00> : vector<8x128xf32>
    %6 = tpu.matmul %5, %3, %cst_4 {dimension_numbers = #tpu.dot_dimension_numbers<[1], [0], [0], [1], [0, 0, 1, 1], [], []>} : vector<8x32xf32>, vector<32x128xf32>, vector<8x128xf32> -> vector<8x128xf32>
    %7 = vector.extract_strided_slice %4 {offsets = [0, 0], sizes = [8, 1], strides = [1, 1]} : vector<8x128xf32> to vector<8x1xf32>
    %8 = vector.extract_strided_slice %4 {offsets = [0, 1], sizes = [8, 1], strides = [1, 1]} : vector<8x128xf32> to vector<8x1xf32>
    %9 = vector.extract_strided_slice %4 {offsets = [0, 2], sizes = [8, 1], strides = [1, 1]} : vector<8x128xf32> to vector<8x1xf32>
    %cst_5 = arith.constant 3.125000e-02 : f32
    %10 = vector.broadcast %cst_5 : f32 to vector<8x1xf32>
    %11 = arith.mulf %9, %10 : vector<8x1xf32>
    %12 = vector.extract_strided_slice %6 {offsets = [0, 2], sizes = [8, 1], strides = [1, 1]} : vector<8x128xf32> to vector<8x1xf32>
    %cst_6 = arith.constant 3.125000e-02 : f32
    %13 = vector.broadcast %cst_6 : f32 to vector<8x1xf32>
    %14 = arith.mulf %12, %13 : vector<8x1xf32>
    %15 = arith.mulf %11, %11 : vector<8x1xf32>
    %16 = arith.subf %14, %15 : vector<8x1xf32>
    %cst_7 = arith.constant 9.99999996E-13 : f32
    %17 = vector.broadcast %cst_7 : f32 to vector<8x1xf32>
    %18 = arith.addf %16, %17 : vector<8x1xf32>
    %19 = math.rsqrt %18 : vector<8x1xf32>
    %c2 = arith.constant 2 : index
    %20 = memref.load %arg3[%c2] : memref<4xf32, #tpu.memory_space<smem>>
    %21 = vector.broadcast %20 : f32 to vector<8x1xf32>
    %22 = arith.mulf %11, %21 : vector<8x1xf32>
    %23 = arith.subf %7, %22 : vector<8x1xf32>
    %24 = arith.mulf %19, %23 : vector<8x1xf32>
    %c0_8 = arith.constant 0 : index
    %25 = memref.load %arg3[%c0_8] : memref<4xf32, #tpu.memory_space<smem>>
    %26 = vector.broadcast %25 : f32 to vector<8x1xf32>
    %27 = arith.addf %24, %26 : vector<8x1xf32>
    %c0_9 = arith.constant 0 : index
    %c0_10 = arith.constant 0 : index
    %28 = vector.load %arg4[%c0_9, %c0_10] : memref<8x2xf32, #tpu.memory_space<vmem>>, vector<8x1xf32>
    tpu.vector_store %arg4[%c0_9, %c0_10], %27 {strides = array<i32>} : memref<8x2xf32, #tpu.memory_space<vmem>>, vector<8x1xf32>,
    %c3 = arith.constant 3 : index
    %29 = memref.load %arg3[%c3] : memref<4xf32, #tpu.memory_space<smem>>
    %30 = vector.broadcast %29 : f32 to vector<8x1xf32>
    %31 = arith.mulf %11, %30 : vector<8x1xf32>
    %32 = arith.subf %8, %31 : vector<8x1xf32>
    %33 = arith.mulf %19, %32 : vector<8x1xf32>
    %c1 = arith.constant 1 : index
    %34 = memref.load %arg3[%c1] : memref<4xf32, #tpu.memory_space<smem>>
    %35 = vector.broadcast %34 : f32 to vector<8x1xf32>
    %36 = arith.addf %33, %35 : vector<8x1xf32>
    %c0_11 = arith.constant 0 : index
    %c1_12 = arith.constant 1 : index
    %37 = vector.load %arg4[%c0_11, %c1_12] : memref<8x2xf32, #tpu.memory_space<vmem>>, vector<8x1xf32>
    tpu.vector_store %arg4[%c0_11, %c1_12], %36 {strides = array<i32>} : memref<8x2xf32, #tpu.memory_space<vmem>>, vector<8x1xf32>,
    return
  }
  func.func @transform_0(%arg0: i32) -> (i32, i32, i32) {
    %c0_i32 = arith.constant 0 : i32
    %c0_i32_0 = arith.constant 0 : i32
    %c0_i32_1 = arith.constant 0 : i32
    return %arg0, %c0_i32, %c0_i32_0 : i32, i32, i32
  }
  func.func @transform_1(%arg0: i32) -> (i32, i32) {
    %c0_i32 = arith.constant 0 : i32
    %c0_i32_0 = arith.constant 0 : i32
    %c0_i32_1 = arith.constant 0 : i32
    return %c0_i32, %c0_i32_0 : i32, i32
  }
  func.func @transform_2(%arg0: i32) -> i32 {
    %c0_i32 = arith.constant 0 : i32
    %c0_i32_0 = arith.constant 0 : i32
    return %c0_i32 : i32
  }
  func.func @transform_3(%arg0: i32) -> (i32, i32) {
    %c0_i32 = arith.constant 0 : i32
    %c0_i32_0 = arith.constant 0 : i32
    return %arg0, %c0_i32 : i32, i32
  }
}

</mosaic_0001>

<bundles_post_ra>
// kernel: tpu_custom_call.1
= control target key start
LH: loop header
LB: loop body
LE: loop exit
PB: predicated region body
PF: predicated region fallthrough
CT: control target
= control target key end

     0   :  { %8 = vsyncpa [#allocation3], 0  ;;  %s903_s0 = inlined_call_operand.hbm [shape: bf16[2,8,32], index: 0, kind: input, shape index: {}]   ;;  %s904_s1 = inlined_call_operand.hbm [shape: f32[32,128], index: 1, kind: input, shape index: {}]   ;;  %s905_s2 = inlined_call_operand.vmem [shape: f32[4], index: 2, kind: input, shape index: {}]   ;;  %s906_s3 = inlined_call_operand.vmem [shape: f32[16,2], index: 3, kind: output, shape index: {}]  }
   0x1   :  { %10 = vsyncpa [#allocation3 + $0x1], 0 }
   0x2   :  { %11 = vsyncpa [#allocation6], 0 }
   0x3   :  { %12 = vsyncpa [#allocation4], 0  ;;  %s771_s12 = smov 0   ;;  %s773_s13 = smov 0  }
   0x4   :  { %s775_s14 = smov 0   ;;  %s777_s15 = smov 0  }
   0x5 LB: > { %s790_s16 = sadd.s32 4294967295, %s738_s15   ;;  %p38_p0 = scmp.ne.s32.totalorder %s730_s13, %s726_s12  ;;  %s738_s15 = sphi %s777_s15, %s923_s15   ;;  %s734_s14 = sphi %s775_s14, %s922_s14   ;;  %s730_s13 = sphi %s773_s13, %s921_s13   ;;  %s726_s12 = sphi %s771_s12, %s920_s12  }
   0x6   : > { %p907_p1 = scmp.eq.s32.totalorder %s790_s16, 0  ;;  %p507_p2 = scmp.ge.s32.totalorder %s738_s15, 1 }
   0x7   : > { %p117_p3 = scmp.lt.s32.totalorder %s738_s15, 3  ;;  %s740_s19 = smov [#allocation5]  }
   0x8   : > { %p798_p4 = por %p907_p1, %p38_p0  ;;  %s129_s20 = sshll.u32 %s740_s19, 4  ;;  %s130_s20 = int_to_ptr.vmem [resolvable:$true] %s129_s20 }
   0x9   : > { %p802_p5 = pnand %p507_p2, %p117_p3  ;;  %s143_s23 = sshll.u32 %s905_s2, 4  ;;  %s144_s23 = int_to_ptr.vmem [resolvable:$true] %s143_s23 }
   0xa   : > { %s910_s17 = scalar_select %p798_p4, 1, 0 }
   0xb   : > { %s911_s18 = scalar_select %p802_p5, 1, 0 }
   0xc   : > { %p567_p6 = pneg %p802_p5  ;;  %s638_s25 = scalar_lea.vmem %s130_s20, 512 }
   0xd   : > { %p639_p9 = scmp.ne.s32.totalorder %s130_s20, %s638_s25  ;;  %p646_p12 = scmp.lt.s32.totalorder %s130_s20, %s130_s20 }
   0xe   : > { %p813_p7 = pnand %p567_p6, %p907_p1  ;;  %p647_p13 = scmp.lt.s32.totalorder %s638_s25, %s638_s25 }
  0x10   : > { %p629_p8 = pneg %p813_p7  ;;  %p648_p0 = por %p647_p13, %p646_p12 }
  0x12   : > { %p641_p10 = pnand %p639_p9, %p629_p8 }
  0x14   : > { %p642_p11 = pneg %p641_p10 }
  0x16   : > { %p649_p2 = pnand %p648_p0, %p642_p11 }
  0x18   : > { %652 = shalt.err (!%p649_p2)
}
  0x19   : > { %s741_s26 = smov 128   ;;  %s742_s27 = smov 8  }
  0x1a   : > { %570 = dma.hbm_to_vmem [thread:$0]  (!%p813_p7), %s904_s1, 512, %s130_s20, [#allocation6], %s741_s26, %s741_s26, %s742_s27  }
  0x1b   : > { %s653_s30 = scalar_lea.vmem %s144_s23, 16  ;;  %p661_p10 = scmp.lt.s32.totalorder %s144_s23, %s144_s23 }
  0x1c   : > { %p654_p3 = scmp.ne.s32.totalorder %s144_s23, %s653_s30  ;;  %p662_p1 = scmp.lt.s32.totalorder %s653_s30, %s653_s30 }
  0x1e   : > { %p656_p6 = pnand %p654_p3, %p629_p8  ;;  %p663_p12 = por %p662_p1, %p661_p10 }
  0x20   : > { %p657_p9 = pneg %p656_p6 }
  0x22   : > { %p664_p11 = pnand %p663_p12, %p657_p9 }
  0x24   : > { %667 = shalt.err (!%p664_p11)
}
  0x25   : > { %s743_s4 = smov [#allocation7]   ;;  %s833_s5 = sadd.s32 1, %s738_s15  }
  0x26   : > { %573 = dma.vmem_to_smem (!%p813_p7), %s144_s23, 16, %s743_s4, [#allocation4]  }
  0x27   : > { %s25_s6 = sadd.s32 1, %s734_s14  ;;  %s22_s7 = ssub.s32 %s738_s15, %s833_s5 }
  0x28   : > { %p32_p1 = scmp.ne.s32.totalorder %s734_s14, %s730_s13  ;;  %p23_p8 = scmp.eq.s32.totalorder %s22_s7, 0 }
  0x29   : > { %p33_p13 = scmp.eq.s32.totalorder %s738_s15, 0  ;;  %p580_p0 = scmp.lt.s32.totalorder %s738_s15, 2 }
  0x2a   : > { %s154_s8 = sand.u32 1, %s734_s14   ;;  %s512_s11 = sshll.u32 %s738_s15, 6 }
  0x2b   : > { %s844_s9 = scalar_select %p23_p8, %s734_s14, %s25_s6  }
  0x2c   : > { %p34_p2 = por %p33_p13, %p32_p1  ;;  %s511_s10 = sshll.u32 %s154_s8, 2 }
  0x2d   : > { %s850_s20 = scalar_lea.hbm %s903_s0, %s512_s11  ;;  %s158_s21 = scalar_lea.vmem [#allocation2], %s511_s10 }
  0x2e   : > { %s165_s22 = sshll.u32 %s158_s21, 4  ;;  %p852_p7 = pnand %p580_p0, %p34_p2  ;;  %s166_s22 = int_to_ptr.vmem [resolvable:$true] %s165_s22 }
  0x2f   : > { %s155_s24 = scalar_lea.sflag [#allocation3], %s154_s8  ;;  %s668_s25 = scalar_lea.hbm %s850_s20, 64 }
  0x30   : > { %p669_p3 = scmp.ne.s32.totalorder %s850_s20, %s668_s25  ;;  %p670_p6 = pneg %p852_p7 }
  0x31   : > { %s673_s27 = scalar_lea.hbm %s903_s0, 128  ;;  %p674_p12 = scmp.lt.s32.totalorder %s850_s20, %s903_s0 }
  0x32   : > { %p671_p9 = pnand %p670_p6, %p669_p3  ;;  %p675_p11 = scmp.lt.s32.totalorder %s673_s27, %s668_s25 }
  0x34   : > { %p672_p10 = pneg %p671_p9  ;;  %p676_p1 = por %p675_p11, %p674_p12 }
  0x36   : > { %p677_p8 = pnand %p676_p1, %p672_p10 }
  0x38   : > { %680 = shalt.err (!%p677_p8)
}
  0x39   : > { %s681_s30 = scalar_lea.vmem %s166_s22, 64  ;;  %s744_s4 = smov [#allocation2]  }
  0x3a   : > { %p682_p13 = scmp.ne.s32.totalorder %s166_s22, %s681_s30  ;;  %s686_s6 = sshll.u32 %s744_s4, 4  ;;  %s687_s6 = int_to_ptr.vmem [resolvable:$false] %s686_s6 }
  0x3b   : > { %s688_s7 = scalar_lea.vmem %s687_s6, 128  ;;  %p689_p3 = scmp.lt.s32.totalorder %s166_s22, %s687_s6 }
  0x3c   : > { %p684_p0 = pnand %p682_p13, %p670_p6  ;;  %p690_p9 = scmp.lt.s32.totalorder %s688_s7, %s681_s30 }
  0x3e   : > { %p685_p2 = pneg %p684_p0  ;;  %p691_p4 = por %p690_p9, %p689_p3 }
  0x40   : > { %p692_p5 = pnand %p691_p4, %p685_p2 }
  0x42   : > { %695 = shalt.err (!%p692_p5)
}
  0x43   : > { %577 = dma.hbm_to_vmem [thread:$0]  (!%p852_p7), %s850_s20, 64, %s166_s22, %s155_s24  }
  0x44   : > { %p914_p10 = scmp.ne.s32.totalorder %s911_s18, 0 }
  0x45   : > { %s176_s8 = sand.u32 (!%p914_p10), 1, %s730_s13   ;;  %p915_p6 = scmp.ne.s32.totalorder (!%p914_p10), %s910_s17, 0 }
  0x46   : > { %174 = sbr.rel (%p914_p10) target bundleno = 647 (0x287), region = 32  ;;  %s514_s10 = sshll.u32 (!%p914_p10), %s176_s8, 2 }
  0x47   : > { %s177_s11 = scalar_lea.sflag (!%p914_p10), [#allocation3], %s176_s8  ;;  %s180_s12 = scalar_lea.vmem (!%p914_p10), [#allocation2], %s514_s10 }
  0x4b   : > { %713 = dma.done.wait (%p915_p6), %s177_s11, 64  }
  0x4c   : > { %715 = vsyncadd (%p915_p6), %s177_s11, 4294967232  ;;  %p916_p4 = scmp.eq.s32.totalorder %s790_s16, 0 }
  0x4e   : > { %717 = dma.done.wait (%p916_p4), [#allocation6], 512   ;;  %p917_p5 = pmov %p916_p4 }
  0x4f   : > { %p918_p7 = pmov %p916_p4 }
  0x50   : > { %719 = vsyncadd (%p917_p5), [#allocation6], 4294966784 }
  0x51   : > { %721 = dma.done.wait (%p918_p7), [#allocation4], 16   ;;  %p919_p12 = pmov %p916_p4 }
  0x53   : > { %723 = vsyncadd (%p919_p12), [#allocation4], 4294967280 }
  0x54   : > { %193 = sfence }
  0x55   : > { %v220_v0 = vld [vmem:[#allocation5 + $0x18] sm:$0xff]  ;;  %v745_v1 = vmov 0.0   ;;  %v219_v2 = vld [vmem:[#allocation5 + $0x10] sm:$0xff]  ;;  %v218_v4 = vld [vmem:[#allocation5 + $0x8] sm:$0xff]  ;;  %vm746_vm0 = vmmov 0   ;;  %vm221_vm1 = vcmask 261120  }
  0x56   : > { %535 = vmatprep.subr.mxu0 %v745_v1  ;;  %546 = vmatprep.subr.mxu1 %v745_v1  ;;  %v215_v3 = vld [vmem:[%s180_s12] sm:$0xf]  ;;  %v217_v6 = vld [vmem:[#allocation5] sm:$0xff]  ;;  %s520_s17 = sld [smem:[#allocation7 + $0x2]]  ;;  %s747_s19 = smov 126   ;;  %vm395_vm2 = vcmask 7168  }
  0x57   : > { %536 = vmatpush3.msra.mxu0 %v220_v0  ;;  %547 = vmatpush3.msra.mxu1 %v220_v0  ;;  %v216_v5 = vunpack.c.l.bf16 %v215_v3  ;;  %s521_s18 = sld [smem:[#allocation7 + $0x3]]  ;;  %s748_s20 = smov 127   ;;  %vm417_vm3 = vcmask 15368  }
  0x58   : > { %537 = vmatprep.subr.mxu0 %v745_v1  ;;  %548 = vmatprep.subr.mxu1 %v745_v1  ;;  %s749_s21 = smov 2   ;;  %s750_s22 = smov 1  }
  0x59   : > { %538 = vmatpush3.msra.mxu0 %v219_v2  ;;  %549 = vmatpush3.msra.mxu1 %v219_v2  ;;  %v295_v7 = vmul.f32 %v216_v5, %v216_v5  ;;  %s388_s23 = sld [smem:[#allocation7]]  ;;  %p211_p11 = scmp.lt.s32.totalorder %s790_s16, 1 }
  0x5a   : > { %539 = vmatprep.subr.mxu0 %v745_v1  ;;  %550 = vmatprep.subr.mxu1 %v745_v1  ;;  %s522_s24 = sld [smem:[#allocation7 + $0x1]] }
  0x5b   : > { %540 = vmatpush3.msra.mxu0 %v218_v4  ;;  %543 = vmatprep.mubr.msk.f32.mxu0 %vm746_vm0, %v745_v1  ;;  %s925_s16 = smov (!%p211_p11, %s790_s16), 1 }
  0x5c   : > { %541 = vmatprep.subr.mxu0 %v745_v1  ;;  %551 = vmatpush3.msra.mxu1 %v218_v4  ;;  %v376_v9 = vstv %s520_s17  ;;  %s517_s25 = sshll.u32 %s925_s16, 3 }
  0x5d   : > { %542 = vmatpush3.msra.mxu0 %v217_v6  ;;  %552 = vmatprep.subr.mxu1 %v745_v1  ;;  %v398_v16 = vstv %s521_s18  ;;  %s214_s27 = scalar_lea.vmem %s906_s3, %s517_s25 }
  0x5e   : > { %544 = vmatmul.mubr.msk.f32.vlgmr.msra.gmra.mxu0 %vm221_vm1, %v216_v5  ;;  %553 = vmatpush3.msra.mxu1 %v217_v6 }
  0x5f   : > { %554 = vmatprep.mubr.msk.f32.mxu1 %vm746_vm0, %v745_v1  ;;  %v389_v26 = vstv %s388_s23 }
  0x60   : > { %555 = vmatmul.mubr.msk.f32.vlgmr.msra.gmra.mxu1 %vm221_vm1, %v295_v7  ;;  %v411_v30 = vstv %s522_s24 }
 0x11e   : > { %v291_v8 = vpop.f32.mrf.mxu0 }
 0x11f   : > { %v369_v10 = vmul.f32 0.03125, %v291_v8 }
 0x120   : > { %v545_v11 = vpop.f32.mrf.mxu0  ;;  %v365_v12 = vpop.f32.mrf.mxu1 }
 0x121   : > { %v370_v13 = vmul.f32 0.03125, %v365_v12  ;;  %v371_v14 = vmul.f32 %v369_v10, %v369_v10  ;;  %v377_v15 = vmul.f32 %v376_v9, %v369_v10  ;;  %v399_v19 = vmul.f32 %v398_v16, %v369_v10 }
 0x122   : > { %v556_v17 = vpop.f32.mrf.mxu1 }
 0x123   : > { %v372_v18 = vsub.f32 %v370_v13, %v371_v14  ;;  %379 = vrot.lane.b32.xlu0 %v377_v15, %s747_s19 }
 0x125   : > { %v373_v24 = vadd.f32 1e-12, %v372_v18 }
 0x127   : > { %401 = vrot.lane.b32.xlu0 %v399_v19, %s748_s20  ;;  %625 = vrsqrt.f32 %v373_v24 }
 0x134   : > { %v626_v25 = vpop.eup %625 }
 0x195   : > { %v380_v20 = vpop.permute.xlu0 %379 }
 0x196   : > { %v382_v21 = vsub.f32 %v291_v8, %v380_v20 }
 0x198   : > { %384 = vrot.lane.b32.xlu1 %v382_v21, %s749_s21 }
 0x199   : > { %v402_v22 = vpop.permute.xlu0 %401 }
 0x19a   : > { %v404_v23 = vsub.f32 %v291_v8, %v402_v22 }
 0x19c   : > { %406 = vrot.lane.b32.xlu1 %v404_v23, %s750_s22 }
 0x20a   : > { %v385_v27 = vpop.permute.xlu1 %384 }
 0x20b   : > { %v387_v28 = vmul.f32 %v626_v25, %v385_v27 }
 0x20d   : > { %v390_v29 = vadd.f32 %v389_v26, %v387_v28 }
 0x20e   : > { %v407_v31 = vpop.permute.xlu1 %406 }
 0x20f   : > { %v409_v32 = vmul.f32 %v626_v25, %v407_v31  ;;  %392 = vrot.lane.b32.xlu0 %v390_v29, %s747_s19 }
 0x211   : > { %v412_v33 = vadd.f32 %v411_v30, %v409_v32 }
 0x213   : > { %414 = vrot.lane.b32.xlu1 %v412_v33, %s748_s20 }
 0x281   : > { %v393_v34 = vpop.permute.xlu0 %392 }
 0x282   : > { %396 = vst.msk [vmem:[%s214_s27] sm:$0xff] %vm395_vm2, %v393_v34 }
 0x285   : > { %v415_v35 = vpop.permute.xlu1 %414 }
 0x286   : > { %418 = vst.msk [vmem:[%s214_s27] sm:$0xff] %vm417_vm3, %v415_v35 }
 0x287 PF: > { %p15_p1 = scmp.ge.s32.totalorder %s833_s5, 4   ;;  %s920_s12 = smov %s730_s13 }
 0x288   : > { %s921_s13 = smov %s734_s14  ;;  %s922_s14 = smov %s844_s9 }
 0x289   : > { %s923_s15 = smov %s833_s5  ;;  %17 = sbr.rel (!%p15_p1) target bundleno = 5 (0x5), region = 81 }
 0x28e   :  { %438 = vsyncpa [#allocation3], 1 }
 0x28f   :  { %440 = vsyncpa [#allocation3 + $0x1], 1 }
 0x290   :  { %441 = vsyncpa [#allocation6], 1 }
 0x291   :  { %442 = vsyncpa [#allocation4], 1 }
 0x292   :  { %444 = vsyncpa [#allocation4 + $0x1], 1 }

</bundles_post_ra>
